<compile_context>
chip_gen: v7x
topology: tpu7x:2x2x1
jax: 0.10.0
libtpu: 0.0.40
codegen_flags: <defaults>
</compile_context>

<pallas_src>
import functools

import jax
import jax.numpy as jnp
from jax.experimental import pallas as pl
from jax.experimental.pallas import tpu as pltpu

T_KERNEL = 3
BN_EPS = 1e-5


# ------------------------------- kernels -----------------------------------
def _tconv_bn_kernel(ss_ref, x_ref, w_ref, o_ref, st_ref, hp_ref, *, apply_bn_relu):
    """[optional BN+ReLU] -> temporal conv (K taps) -> per-channel stat partials.

    ss_ref: (2, Ci) f32 folded scale/shift (row 0 = scale, row 1 = shift)
    x_ref : (T, N, Ci) f32 activation block (one batch element)
    w_ref : (K, Ci, Co) bf16 temporal-conv weights
    o_ref : (T, N, Co) f32 raw conv output (pre-BN)
    st_ref: (2, Co) f32 per-block partial (sum, sum-sq)
    hp_ref: (T + 2*pad, N, Ci) bf16 scratch (T-padded activation)
    """
    T, N, Ci = x_ref.shape
    K, _, Co = w_ref.shape
    pad = (K - 1) // 2

    h = x_ref[...]
    if apply_bn_relu:
        scale = ss_ref[0:1, :].reshape(1, 1, Ci)
        shift = ss_ref[1:2, :].reshape(1, 1, Ci)
        h = jnp.maximum(h * scale + shift, 0.0)

    # Fill the T-padded scratch (borders re-zeroed every step: cheap and safe
    # under megacore "parallel" scheduling; no in-kernel concat copies).
    if pad > 0:
        hp_ref[0:pad] = jnp.zeros((pad, N, Ci), hp_ref.dtype)
        hp_ref[pad + T:] = jnp.zeros((pad, N, Ci), hp_ref.dtype)
    hp_ref[pad:pad + T] = h.astype(hp_ref.dtype)

    # K static tap slices of the padded buffer; tight MXU accumulation chain.
    acc = jnp.zeros((T * N, Co), jnp.float32)
    for k in range(K):  # static unroll
        tap = hp_ref[k:k + T].reshape(T * N, Ci)
        acc = acc + jax.lax.dot_general(tap, w_ref[k], (((1,), (0,)), ((), ())),
                                        preferred_element_type=jnp.float32)

    st_ref[0:1, :] = jnp.sum(acc, axis=0, keepdims=True)
    st_ref[1:2, :] = jnp.sum(acc * acc, axis=0, keepdims=True)
    o_ref[...] = acc.reshape(T, N, Co)


def _gconv_bn_kernel(ss_ref, h_ref, a_ref, wth_ref, o_ref, st_ref):
    """BN+ReLU -> adjacency mix (A @ .) -> 1x1 conv (theta) -> stat partials."""
    T, N, C = h_ref.shape
    Co = wth_ref.shape[1]

    scale = ss_ref[0:1, :].reshape(1, 1, C)
    shift = ss_ref[1:2, :].reshape(1, 1, C)
    hb = jnp.maximum(h_ref[...] * scale + shift, 0.0).astype(jnp.bfloat16)

    # Per-block broadcast of A only (T x N x N, small); C stays the lane dim.
    a_b = jnp.broadcast_to(a_ref[...], (T, N, N))
    hg = jax.lax.dot_general(a_b, hb, (((2,), (1,)), ((0,), (0,))),
                             preferred_element_type=jnp.float32)          # (T, N, C)

    ht = jax.lax.dot_general(hg.astype(jnp.bfloat16).reshape(T * N, C), wth_ref[...],
                             (((1,), (0,)), ((), ())),
                             preferred_element_type=jnp.float32)          # (T*N, Co)

    st_ref[0:1, :] = jnp.sum(ht, axis=0, keepdims=True)
    st_ref[1:2, :] = jnp.sum(ht * ht, axis=0, keepdims=True)
    o_ref[...] = ht.reshape(T, N, Co)


def _bn_relu_kernel(ss_ref, h_ref, o_ref):
    """Final BN+ReLU epilogue."""
    C = h_ref.shape[-1]
    scale = ss_ref[0:1, :].reshape(1, 1, C)
    shift = ss_ref[1:2, :].reshape(1, 1, C)
    o_ref[...] = jnp.maximum(h_ref[...] * scale + shift, 0.0)


# ------------------------------- wrapper ------------------------------------
def _bn_scale_shift(partials, count, gamma, beta):
    """Reduce per-block (sum, sum-sq) partials -> folded (scale, shift) (2, C)."""
    s = jnp.sum(partials, axis=0)                       # (2, C)
    mean = s[0] / count
    var = jnp.maximum(s[1] / count - mean * mean, 0.0)  # biased, training-mode
    scale = gamma.reshape(-1) * jax.lax.rsqrt(var + BN_EPS)
    shift = beta.reshape(-1) - mean * scale
    return jnp.stack([scale, shift], axis=0).astype(jnp.float32)


def stgcn_layer(x_nchw, A, params):
    B, C_in, T, N = x_nchw.shape
    K, _, C_out = params["w1"].shape
    pad = (K - 1) // 2
    count = float(B * T * N)
    bf16 = jnp.bfloat16

    # Boundary layout change only (module interface is NCHW).
    x = jnp.transpose(x_nchw, (0, 2, 3, 1)).astype(jnp.float32)   # (B, T, N, Cin)

    w1 = params["w1"].astype(bf16)                                # (K, Cin, Co)
    wth = params["wth"].astype(bf16)                              # (Co, Co)
    w2 = params["w2"].astype(bf16)                                # (K, Co, Co)
    a_bf = A.astype(bf16)                                         # (N, N)

    cp = pltpu.CompilerParams(dimension_semantics=("parallel",))

    def act_spec(t, n, c):      # (B, t, n, c) array gridded over B, B-dim squeezed
        return pl.BlockSpec((None, t, n, c), lambda b: (b, 0, 0, 0))

    def stat_spec(c):
        return pl.BlockSpec((None, 2, c), lambda b: (b, 0, 0))

    def full_spec(shape):
        nd = len(shape)
        return pl.BlockSpec(shape, lambda b: (0,) * nd)

    # -------- stage 1: temporal conv 1 (+ BN1 stat partials) --------
    ss0 = jnp.zeros((2, C_in), jnp.float32)  # unused (no BN before first conv)
    h1, st1 = pl.pallas_call(
        functools.partial(_tconv_bn_kernel, apply_bn_relu=False),
        out_shape=(jax.ShapeDtypeStruct((B, T, N, C_out), jnp.float32),
                   jax.ShapeDtypeStruct((B, 2, C_out), jnp.float32)),
        grid=(B,),
        in_specs=[full_spec((2, C_in)), act_spec(T, N, C_in), full_spec((K, C_in, C_out))],
        out_specs=(act_spec(T, N, C_out), stat_spec(C_out)),
        scratch_shapes=[pltpu.VMEM((T + 2 * pad, N, C_in), bf16)],
        compiler_params=cp,
    )(ss0, x, w1)
    ss1 = _bn_scale_shift(st1, count, params["g1"], params["b1"])

    # -------- stage 2: BN1+ReLU -> graph conv (+ BN2 stat partials) --------
    h2, st2 = pl.pallas_call(
        _gconv_bn_kernel,
        out_shape=(jax.ShapeDtypeStruct((B, T, N, C_out), jnp.float32),
                   jax.ShapeDtypeStruct((B, 2, C_out), jnp.float32)),
        grid=(B,),
        in_specs=[full_spec((2, C_out)), act_spec(T, N, C_out),
                  full_spec((N, N)), full_spec((C_out, C_out))],
        out_specs=(act_spec(T, N, C_out), stat_spec(C_out)),
        compiler_params=cp,
    )(ss1, h1, a_bf, wth)
    ss2 = _bn_scale_shift(st2, count, params["g2"], params["b2"])

    # -------- stage 3: BN2+ReLU -> temporal conv 2 (+ BN3 stat partials) --------
    h3, st3 = pl.pallas_call(
        functools.partial(_tconv_bn_kernel, apply_bn_relu=True),
        out_shape=(jax.ShapeDtypeStruct((B, T, N, C_out), jnp.float32),
                   jax.ShapeDtypeStruct((B, 2, C_out), jnp.float32)),
        grid=(B,),
        in_specs=[full_spec((2, C_out)), act_spec(T, N, C_out),
                  full_spec((K, C_out, C_out))],
        out_specs=(act_spec(T, N, C_out), stat_spec(C_out)),
        scratch_shapes=[pltpu.VMEM((T + 2 * pad, N, C_out), bf16)],
        compiler_params=cp,
    )(ss2, h2, w2)
    ss3 = _bn_scale_shift(st3, count, params["g3"], params["b3"])

    # -------- stage 4: final BN3+ReLU --------
    out = pl.pallas_call(
        _bn_relu_kernel,
        out_shape=jax.ShapeDtypeStruct((B, T, N, C_out), jnp.float32),
        grid=(B,),
        in_specs=[full_spec((2, C_out)), act_spec(T, N, C_out)],
        out_specs=act_spec(T, N, C_out),
        compiler_params=cp,
    )(ss3, h3)

    return jnp.transpose(out, (0, 3, 1, 2))                      # (B, C_out, T, N)


# ------------------------- deterministic parameters -------------------------
def init_params(key, in_c, out_c, t_kernel=T_KERNEL):
    k1, k2, k3 = jax.random.split(key, 3)
    w1 = jax.random.normal(k1, (t_kernel, in_c, out_c), jnp.float32) * \
        (2.0 / (in_c * t_kernel)) ** 0.5
    wth = jax.random.normal(k2, (out_c, out_c), jnp.float32) * (2.0 / out_c) ** 0.5
    w2 = jax.random.normal(k3, (t_kernel, out_c, out_c), jnp.float32) * \
        (2.0 / (out_c * t_kernel)) ** 0.5
    ones = jnp.ones((1, out_c), jnp.float32)
    zeros = jnp.zeros((1, out_c), jnp.float32)
    return dict(w1=w1, wth=wth, w2=w2,
                g1=ones, b1=zeros, g2=ones, b2=zeros, g3=ones, b3=zeros)


# --------------------------- pure-JAX reference -----------------------------
def _reference(x_nchw, A, p):
    x = jnp.transpose(x_nchw, (0, 2, 3, 1))  # (B,T,N,C)

    def tconv(h, w):
        K = w.shape[0]
        pad = (K - 1) // 2
        hp = jnp.pad(h, ((0, 0), (pad, pad), (0, 0), (0, 0)))
        T = h.shape[1]
        return sum(jnp.einsum("btnc,cd->btnd", hp[:, k:k + T], w[k])
                   for k in range(K))

    def bnrelu(h, g, b):
        m = h.mean(axis=(0, 1, 2), keepdims=True)
        v = ((h - m) ** 2).mean(axis=(0, 1, 2), keepdims=True)
        return jnp.maximum((h - m) / jnp.sqrt(v + BN_EPS) * g + b, 0.0)

    h = bnrelu(tconv(x, p["w1"]), p["g1"], p["b1"])
    h = jnp.einsum("nm,btmc->btnc", A, h)                 # adjacency first
    h = jnp.einsum("btnc,cd->btnd", h, p["wth"])          # then theta (1x1 conv)
    h = bnrelu(h, p["g2"], p["b2"])
    h = bnrelu(tconv(h, p["w2"]), p["g3"], p["b3"])
    return jnp.transpose(h, (0, 3, 1, 2))


if __name__ == "__main__":
    key = jax.random.PRNGKey(0)
    kx, ka, kp = jax.random.split(key, 3)

    B, C_in, C_out, T, N = 2, 4, 32, 8, 16
    x = jax.random.normal(kx, (B, C_in, T, N), jnp.float32)   # NCHW input
    A = jax.random.uniform(ka, (N, N), jnp.float32)
    A = A / jnp.sum(A, axis=1, keepdims=True)                 # row-normalized adjacency
    params = init_params(kp, C_in, C_out)

    out = jax.block_until_ready(stgcn_layer(x, A, params))
    assert out.shape == (B, C_out, T, N), out.shape

    ref = _reference(x, A, params)                            # pure-f32 reference
    assert bool(jnp.all(jnp.isfinite(out)))
    # bf16 MXU stages re-standardized by BatchNorm give ~1% per-element std vs f32:
    # tight check on RMS, loose check on the worst element.
    err = jnp.abs(out - ref)
    assert float(jnp.sqrt(jnp.mean(err ** 2))) < 2e-2
    assert bool(jnp.allclose(out, ref, atol=5e-2, rtol=5e-2))
    print("KERNEL_OK")
</pallas_src>

<mosaic_0001>
module attributes {stable_mosaic.version = 11 : i64} {
  func.func @_tconv_bn_kernel(%arg0: i32, %arg1: memref<2x4xf32, #tpu.memory_space<vmem>>, %arg2: memref<1x8x16x4xf32, #tpu.memory_space<vmem>>, %arg3: memref<3x4x32xbf16, #tpu.memory_space<vmem>>, %arg4: memref<1x8x16x32xf32, #tpu.memory_space<vmem>>, %arg5: memref<1x2x32xf32, #tpu.memory_space<vmem>>, %arg6: memref<10x16x4xbf16, #tpu.memory_space<vmem>>) attributes {dimension_semantics = [#tpu.dimension_semantics<parallel>], iteration_bounds = array<i64: 2>, scalar_prefetch = 0 : i64, scratch_operands = 1 : i64, tpu.core_type = #tpu.core_type<tc>, window_params = [{pipeline_mode = #tpu.pipeline_mode<synchronous>, transform_indices = @transform_0, window_bounds = array<i64: 2, 4>}, {transform_indices = @transform_1, window_bounds = array<i64: 1, 8, 16, 4>}, {pipeline_mode = #tpu.pipeline_mode<synchronous>, transform_indices = @transform_2, window_bounds = array<i64: 3, 4, 32>}, {transform_indices = @transform_3, window_bounds = array<i64: 1, 8, 16, 32>}, {transform_indices = @transform_4, window_bounds = array<i64: 1, 2, 32>}]} {
    %c0 = arith.constant 0 : index
    %c0_0 = arith.constant 0 : index
    %c0_1 = arith.constant 0 : index
    %c0_2 = arith.constant 0 : index
    %0 = vector.load %arg2[%c0, %c0_0, %c0_1, %c0_2] : memref<1x8x16x4xf32, #tpu.memory_space<vmem>>, vector<1x8x16x4xf32>
    %1 = vector.shape_cast %0 : vector<1x8x16x4xf32> to vector<8x16x4xf32>
    %cst = arith.constant 0.000000e+00 : bf16
    %2 = vector.broadcast %cst : bf16 to vector<1x16x4xbf16>
    %c0_3 = arith.constant 0 : index
    %c0_4 = arith.constant 0 : index
    %c0_5 = arith.constant 0 : index
    %3 = vector.load %arg6[%c0_3, %c0_4, %c0_5] : memref<10x16x4xbf16, #tpu.memory_space<vmem>>, vector<1x16x4xbf16>
    tpu.vector_store %arg6[%c0_3, %c0_4, %c0_5], %2 {strides = array<i32>} : memref<10x16x4xbf16, #tpu.memory_space<vmem>>, vector<1x16x4xbf16>,
    %cst_6 = arith.constant 0.000000e+00 : bf16
    %4 = vector.broadcast %cst_6 : bf16 to vector<1x16x4xbf16>
    %c9 = arith.constant 9 : index
    %c0_7 = arith.constant 0 : index
    %c0_8 = arith.constant 0 : index
    %5 = vector.load %arg6[%c9, %c0_7, %c0_8] : memref<10x16x4xbf16, #tpu.memory_space<vmem>>, vector<1x16x4xbf16>
    tpu.vector_store %arg6[%c9, %c0_7, %c0_8], %4 {strides = array<i32>} : memref<10x16x4xbf16, #tpu.memory_space<vmem>>, vector<1x16x4xbf16>,
    %6 = arith.truncf %1 : vector<8x16x4xf32> to vector<8x16x4xbf16>
    %c1 = arith.constant 1 : index
    %c0_9 = arith.constant 0 : index
    %c0_10 = arith.constant 0 : index
    %7 = vector.load %arg6[%c1, %c0_9, %c0_10] : memref<10x16x4xbf16, #tpu.memory_space<vmem>>, vector<8x16x4xbf16>
    tpu.vector_store %arg6[%c1, %c0_9, %c0_10], %6 {strides = array<i32>} : memref<10x16x4xbf16, #tpu.memory_space<vmem>>, vector<8x16x4xbf16>,
    %cst_11 = arith.constant 0.000000e+00 : f32
    %8 = vector.broadcast %cst_11 : f32 to vector<128x32xf32>
    %c0_12 = arith.constant 0 : index
    %c0_13 = arith.constant 0 : index
    %c0_14 = arith.constant 0 : index
    %9 = vector.load %arg6[%c0_12, %c0_13, %c0_14] : memref<10x16x4xbf16, #tpu.memory_space<vmem>>, vector<8x16x4xbf16>
    %10 = vector.shape_cast %9 : vector<8x16x4xbf16> to vector<128x4xbf16>
    %c0_15 = arith.constant 0 : index
    %c0_16 = arith.constant 0 : index
    %c0_17 = arith.constant 0 : index
    %11 = vector.load %arg3[%c0_15, %c0_16, %c0_17] : memref<3x4x32xbf16, #tpu.memory_space<vmem>>, vector<1x4x32xbf16>
    %12 = vector.shape_cast %11 : vector<1x4x32xbf16> to vector<4x32xbf16>
    %cst_18 = arith.constant dense<0.000000e+00> : vector<128x32xf32>
    %13 = tpu.matmul %10, %12, %cst_18 {dimension_numbers = #tpu.dot_dimension_numbers<[1], [0], [0], [1], [0, 0, 1, 1], [], []>} : vector<128x4xbf16>, vector<4x32xbf16>, vector<128x32xf32> -> vector<128x32xf32>
    %14 = arith.addf %8, %13 : vector<128x32xf32>
    %c1_19 = arith.constant 1 : index
    %c0_20 = arith.constant 0 : index
    %c0_21 = arith.constant 0 : index
    %15 = vector.load %arg6[%c1_19, %c0_20, %c0_21] : memref<10x16x4xbf16, #tpu.memory_space<vmem>>, vector<8x16x4xbf16>
    %16 = vector.shape_cast %15 : vector<8x16x4xbf16> to vector<128x4xbf16>
    %c1_22 = arith.constant 1 : index
    %c0_23 = arith.constant 0 : index
    %c0_24 = arith.constant 0 : index
    %17 = vector.load %arg3[%c1_22, %c0_23, %c0_24] : memref<3x4x32xbf16, #tpu.memory_space<vmem>>, vector<1x4x32xbf16>
    %18 = vector.shape_cast %17 : vector<1x4x32xbf16> to vector<4x32xbf16>
    %cst_25 = arith.constant dense<0.000000e+00> : vector<128x32xf32>
    %19 = tpu.matmul %16, %18, %cst_25 {dimension_numbers = #tpu.dot_dimension_numbers<[1], [0], [0], [1], [0, 0, 1, 1], [], []>} : vector<128x4xbf16>, vector<4x32xbf16>, vector<128x32xf32> -> vector<128x32xf32>
    %20 = arith.addf %14, %19 : vector<128x32xf32>
    %c2 = arith.constant 2 : index
    %c0_26 = arith.constant 0 : index
    %c0_27 = arith.constant 0 : index
    %21 = vector.load %arg6[%c2, %c0_26, %c0_27] : memref<10x16x4xbf16, #tpu.memory_space<vmem>>, vector<8x16x4xbf16>
    %22 = vector.shape_cast %21 : vector<8x16x4xbf16> to vector<128x4xbf16>
    %c2_28 = arith.constant 2 : index
    %c0_29 = arith.constant 0 : index
    %c0_30 = arith.constant 0 : index
    %23 = vector.load %arg3[%c2_28, %c0_29, %c0_30] : memref<3x4x32xbf16, #tpu.memory_space<vmem>>, vector<1x4x32xbf16>
    %24 = vector.shape_cast %23 : vector<1x4x32xbf16> to vector<4x32xbf16>
    %cst_31 = arith.constant dense<0.000000e+00> : vector<128x32xf32>
    %25 = tpu.matmul %22, %24, %cst_31 {dimension_numbers = #tpu.dot_dimension_numbers<[1], [0], [0], [1], [0, 0, 1, 1], [], []>} : vector<128x4xbf16>, vector<4x32xbf16>, vector<128x32xf32> -> vector<128x32xf32>
    %26 = arith.addf %20, %25 : vector<128x32xf32>
    %cst_32 = arith.constant dense<0.000000e+00> : vector<32xf32>
    %27 = vector.multi_reduction <add>, %26, %cst_32 [0] : vector<128x32xf32> to vector<32xf32>
    %28 = vector.shape_cast %27 : vector<32xf32> to vector<1x32xf32>
    %c0_33 = arith.constant 0 : index
    %c0_34 = arith.constant 0 : index
    %c0_35 = arith.constant 0 : index
    %29 = vector.load %arg5[%c0_33, %c0_34, %c0_35] : memref<1x2x32xf32, #tpu.memory_space<vmem>>, vector<1x1x32xf32>
    %30 = vector.shape_cast %29 : vector<1x1x32xf32> to vector<1x32xf32>
    %31 = vector.shape_cast %28 : vector<1x32xf32> to vector<1x1x32xf32>
    tpu.vector_store %arg5[%c0_33, %c0_34, %c0_35], %31 {strides = array<i32>} : memref<1x2x32xf32, #tpu.memory_space<vmem>>, vector<1x1x32xf32>,
    %32 = arith.mulf %26, %26 : vector<128x32xf32>
    %cst_36 = arith.constant dense<0.000000e+00> : vector<32xf32>
    %33 = vector.multi_reduction <add>, %32, %cst_36 [0] : vector<128x32xf32> to vector<32xf32>
    %34 = vector.shape_cast %33 : vector<32xf32> to vector<1x32xf32>
    %c0_37 = arith.constant 0 : index
    %c1_38 = arith.constant 1 : index
    %c0_39 = arith.constant 0 : index
    %35 = vector.load %arg5[%c0_37, %c1_38, %c0_39] : memref<1x2x32xf32, #tpu.memory_space<vmem>>, vector<1x1x32xf32>
    %36 = vector.shape_cast %35 : vector<1x1x32xf32> to vector<1x32xf32>
    %37 = vector.shape_cast %34 : vector<1x32xf32> to vector<1x1x32xf32>
    tpu.vector_store %arg5[%c0_37, %c1_38, %c0_39], %37 {strides = array<i32>} : memref<1x2x32xf32, #tpu.memory_space<vmem>>, vector<1x1x32xf32>,
    %38 = vector.shape_cast %26 : vector<128x32xf32> to vector<8x16x32xf32>
    %c0_40 = arith.constant 0 : index
    %c0_41 = arith.constant 0 : index
    %c0_42 = arith.constant 0 : index
    %c0_43 = arith.constant 0 : index
    %39 = vector.load %arg4[%c0_40, %c0_41, %c0_42, %c0_43] : memref<1x8x16x32xf32, #tpu.memory_space<vmem>>, vector<1x8x16x32xf32>
    %40 = vector.shape_cast %39 : vector<1x8x16x32xf32> to vector<8x16x32xf32>
    %41 = vector.shape_cast %38 : vector<8x16x32xf32> to vector<1x8x16x32xf32>
    tpu.vector_store %arg4[%c0_40, %c0_41, %c0_42, %c0_43], %41 {strides = array<i32>} : memref<1x8x16x32xf32, #tpu.memory_space<vmem>>, vector<1x8x16x32xf32>,
    return
  }
  func.func @transform_0(%arg0: i32) -> (i32, i32) {
    %c0_i32 = arith.constant 0 : i32
    %c0_i32_0 = arith.constant 0 : i32
    %c0_i32_1 = arith.constant 0 : i32
    return %c0_i32, %c0_i32_0 : i32, i32
  }
  func.func @transform_1(%arg0: i32) -> (i32, i32, i32, i32) {
    %c0_i32 = arith.constant 0 : i32
    %c0_i32_0 = arith.constant 0 : i32
    %c0_i32_1 = arith.constant 0 : i32
    %c0_i32_2 = arith.constant 0 : i32
    return %arg0, %c0_i32, %c0_i32_0, %c0_i32_1 : i32, i32, i32, i32
  }
  func.func @transform_2(%arg0: i32) -> (i32, i32, i32) {
    %c0_i32 = arith.constant 0 : i32
    %c0_i32_0 = arith.constant 0 : i32
    %c0_i32_1 = arith.constant 0 : i32
    %c0_i32_2 = arith.constant 0 : i32
    return %c0_i32, %c0_i32_0, %c0_i32_1 : i32, i32, i32
  }
  func.func @transform_3(%arg0: i32) -> (i32, i32, i32, i32) {
    %c0_i32 = arith.constant 0 : i32
    %c0_i32_0 = arith.constant 0 : i32
    %c0_i32_1 = arith.constant 0 : i32
    %c0_i32_2 = arith.constant 0 : i32
    return %arg0, %c0_i32, %c0_i32_0, %c0_i32_1 : i32, i32, i32, i32
  }
  func.func @transform_4(%arg0: i32) -> (i32, i32, i32) {
    %c0_i32 = arith.constant 0 : i32
    %c0_i32_0 = arith.constant 0 : i32
    %c0_i32_1 = arith.constant 0 : i32
    return %arg0, %c0_i32, %c0_i32_0 : i32, i32, i32
  }
}

</mosaic_0001>

<bundles_post_ra>
// kernel: tpu_custom_call.1
= control target key start
LH: loop header
LB: loop body
LE: loop exit
PB: predicated region body
PF: predicated region fallthrough
CT: control target
= control target key end

     0   :  { %10 = vsyncpa [#allocation4], 0  ;;  %s1489_s0 = inlined_call_operand.vmem [shape: f32[2,4], index: 0, kind: input, shape index: {}]   ;;  %s1490_s1 = inlined_call_operand.vmem [shape: f32[2,8,16,4], index: 1, kind: input, shape index: {}]   ;;  %s1491_s2 = inlined_call_operand.vmem [shape: bf16[3,4,32], index: 2, kind: input, shape index: {}]   ;;  %s1492_s3 = inlined_call_operand.hbm [shape: f32[2,8,16,32], index: 3, kind: output, shape index: {0}]   ;;  %s1493_s4 = inlined_call_operand.hbm [shape: f32[2,2,32], index: 4, kind: output, shape index: {1}]  }
   0x1   :  { %12 = vsyncpa [#allocation4 + $0x1], 0 }
   0x2   :  { %13 = vsyncpa [#allocation6], 0 }
   0x3   :  { %15 = vsyncpa [#allocation6 + $0x1], 0  ;;  %s1235_s15 = smov 0   ;;  %s1237_s16 = smov 0  }
   0x4   :  { %s1239_s0 = smov 0   ;;  %s1241_s17 = smov 0  }
   0x5 LB: > { %s1256_s18 = sadd.s32 4294967295, %s1203_s17   ;;  %s900_s19 = sadd.s32 4294967294, %s1203_s17   ;;  %s1203_s17 = sphi %s1241_s17, %s1499_s17   ;;  %s1199_s0 = sphi %s1239_s0, %s1498_s0   ;;  %s1195_s16 = sphi %s1237_s16, %s1497_s16   ;;  %s1191_s15 = sphi %s1235_s15, %s1496_s15  }
   0x6   : > { %s1260_s20 = sadd.s32 1, %s1203_s17   ;;  %s96_s21 = sadd.s32 1, %s1199_s0 }
   0x7   : > { %s93_s22 = ssub.s32 %s1203_s17, %s1260_s20  ;;  %p106_p0 = scmp.ne.s32.totalorder %s1199_s0, %s1195_s16 }
   0x8   : > { %p94_p1 = scmp.eq.s32.totalorder %s93_s22, 0  ;;  %p107_p2 = scmp.eq.s32.totalorder %s1256_s18, 1 }
   0x9   : > { %p112_p3 = scmp.ne.s32.totalorder %s1195_s16, %s1191_s15  ;;  %p113_p4 = scmp.eq.s32.totalorder %s900_s19, 1 }
   0xa   : > { %s1271_s23 = scalar_select %p94_p1, %s1199_s0, %s96_s21  }
   0xb   : > { %p1273_p5 = por %p107_p2, %p106_p0  ;;  %p1277_p6 = por %p113_p4, %p112_p3 }
   0xc   : > { %p903_p7 = scmp.ge.s32.totalorder %s1203_s17, 1  ;;  %p171_p8 = scmp.lt.s32.totalorder %s1203_s17, 3 }
   0xe   : > { %p172_p9 = pnand %p903_p7, %p171_p8 }
   0xf   : > { %v908_v0 = vld [vmem:[%s1491_s2 + $0x2] sm:$0x3] (!%p172_p9)  ;;  %vm288_vm0 = vcmask (!%p172_p9), 1041408   ;;  %v253_v1 = vld [vmem:[%s1491_s2] sm:$0x3] (!%p172_p9)  ;;  %vm224_vm1 = vcmask (!%p172_p9), 31744  }
  0x10   : > { %175 = sbr.rel (%p172_p9) target bundleno = 343 (0x157), region = 32  ;;  %1058 = vmatprep.subr.msk.bf16.mxu1 (!%p172_p9), %vm288_vm0, %v908_v0  ;;  %1059 = vmatprep.subr.msk.bf16.mxu0 (!%p172_p9), %vm288_vm0, %v253_v1  ;;  %v290_v2 = vsel (!%p172_p9), %vm288_vm0, %v908_v0, 0  ;;  %v414_v3 = vsel (!%p172_p9), %vm288_vm0, %v253_v1, 0  ;;  %p202_p10 = scmp.lt.s32.totalorder (!%p172_p9), %s1256_s18, 1  ;;  %v925_v4 = vld [vmem:[%s1491_s2 + $0x4] sm:$0x3] (!%p172_p9) }
  0x11   : > { %971 = vmatpush3.bf16.msra.mxu1 (!%p172_p9), %v290_v2  ;;  %989 = vmatpush3.bf16.msra.mxu0 (!%p172_p9), %v414_v3  ;;  %v1205_v5 = vmov (!%p172_p9), 0   ;;  %v549_v31 = vsel (!%p172_p9), %vm288_vm0, %v925_v4, 0  ;;  %s1339_s11 = sand.u32 (!%p172_p9), 1, %s1195_s16   ;;  %vm664_vm2 = vcmask (!%p172_p9), 261120   ;;  %s942_s14 = sshll.u32 (!%p172_p9), %s1256_s18, 11 }
  0x12   : > { %225 = vst.msk [vmem:[#allocation2] sm:$0xff] (!%p172_p9), %vm224_vm1, %v1205_v5  ;;  %227 = vst.msk [vmem:[#allocation2 + $0x48] sm:$0xff] (!%p172_p9), %vm224_vm1, %v1205_v5  ;;  %1060 = vmatprep.subr.msk.bf16.mxu1 (!%p172_p9), %vm288_vm0, %v253_v1  ;;  %1061 = vmatprep.subr.msk.bf16.mxu0 (!%p172_p9), %vm288_vm0, %v925_v4  ;;  %s904_s12 = sshll.u32 (!%p172_p9), %s1339_s11, 7  ;;  %s1399_s26 = scalar_lea.hbm (!%p172_p9), %s1492_s3, %s942_s14 }
  0x13   : > { %s1342_s13 = scalar_lea.vmem (!%p172_p9), [#allocation3], %s904_s12  ;;  %s775_s27 = scalar_lea.sflag (!%p172_p9), [#allocation4], %s1339_s11 }
  0x14   : > { %s793_s19 = sshll.u32 (!%p172_p9), %s1342_s13, 4  ;;  %s1206_s29 = smov (!%p172_p9), [#allocation3]   ;;  %s1401_s19 = int_to_ptr.vmem [resolvable:$true] %s793_s19 }
  0x15   : > { %s1109_s28 = scalar_lea.vmem (!%p172_p9), %s1401_s19, 2048  ;;  %s1113_s30 = sshll.u32 (!%p172_p9), %s1206_s29, 4  ;;  %s1114_s30 = int_to_ptr.vmem [resolvable:$false] %s1113_s30 }
  0x16   : > { %p1110_p11 = scmp.ne.s32.totalorder (!%p172_p9), %s1401_s19, %s1109_s28  ;;  %s1115_s5 = scalar_lea.vmem (!%p172_p9), %s1114_s30, 4096 }
  0x17   : > { %s203_s6 = scalar_select %p202_p10, %s1256_s18, 1 }
  0x18   : > { %p1111_p12 = pnand %p1110_p11, %p1273_p5  ;;  %p1116_p0 = scmp.lt.s32.totalorder %s1401_s19, %s1114_s30 }
  0x19   : > { %s941_s7 = sshll.u32 %s203_s6, 7  ;;  %v245_v13 = vld [vmem:[#allocation2] sm:$0xff]  ;;  %v521_v40 = vld [vmem:[#allocation2 + $0x48] sm:$0xff]  ;;  %p1117_p1 = scmp.lt.s32.totalorder %s1115_s5, %s1109_s28 }
  0x1a   : > { %s206_s10 = scalar_lea.vmem %s1490_s1, %s941_s7  ;;  %990 = vmatprep.mubr.msk.bf16.mxu0 %vm224_vm1, %v245_v13  ;;  %p1112_p13 = pneg %p1111_p12 }
  0x1b   : > { %v208_v6 = vld [vmem:[%s206_s10] sm:$0xff]  ;;  %v209_v7 = vld [vmem:[%s206_s10 + $0x8] sm:$0xff]  ;;  %v210_v8 = vld [vmem:[%s206_s10 + $0x10] sm:$0xff]  ;;  %p1118_p2 = por %p1117_p1, %p1116_p0 }
  0x1c   : > { %v228_v9 = vpack.c.bf16 %v209_v7, %v208_v6  ;;  %v211_v10 = vld [vmem:[%s206_s10 + $0x18] sm:$0xff]  ;;  %v212_v11 = vld [vmem:[%s206_s10 + $0x20] sm:$0xff]  ;;  %v213_v12 = vld [vmem:[%s206_s10 + $0x28] sm:$0xff] }
  0x1d   : > { %v229_v14 = vpack.c.bf16 %v211_v10, %v210_v8  ;;  %v230_v15 = vpack.c.bf16 %v213_v12, %v212_v11  ;;  %v214_v16 = vld [vmem:[%s206_s10 + $0x30] sm:$0xff]  ;;  %v215_v17 = vld [vmem:[%s206_s10 + $0x38] sm:$0xff]  ;;  %v216_v19 = vld [vmem:[%s206_s10 + $0x40] sm:$0xff]  ;;  %p1119_p3 = pnand %p1118_p2, %p1112_p13 }
  0x1e   : > { %237 = vst.msk [vmem:[#allocation2 + $0x8] sm:$0xff] %vm224_vm1, %v228_v9  ;;  %v231_v18 = vpack.c.bf16 %v215_v17, %v214_v16  ;;  %v217_v20 = vld [vmem:[%s206_s10 + $0x48] sm:$0xff]  ;;  %v218_v21 = vld [vmem:[%s206_s10 + $0x50] sm:$0xff]  ;;  %v219_v23 = vld [vmem:[%s206_s10 + $0x58] sm:$0xff] }
  0x1f   : > { %238 = vst.msk [vmem:[#allocation2 + $0x10] sm:$0xff] %vm224_vm1, %v229_v14  ;;  %239 = vst.msk [vmem:[#allocation2 + $0x18] sm:$0xff] %vm224_vm1, %v230_v15  ;;  %v232_v22 = vpack.c.bf16 %v217_v20, %v216_v19  ;;  %v220_v24 = vld [vmem:[%s206_s10 + $0x60] sm:$0xff]  ;;  %v221_v25 = vld [vmem:[%s206_s10 + $0x68] sm:$0xff]  ;;  %v233_v26 = vpack.c.bf16 %v219_v23, %v218_v21 }
  0x20   : > { %240 = vst.msk [vmem:[#allocation2 + $0x20] sm:$0xff] %vm224_vm1, %v231_v18  ;;  %v234_v27 = vpack.c.bf16 %v221_v25, %v220_v24  ;;  %v222_v28 = vld [vmem:[%s206_s10 + $0x70] sm:$0xff]  ;;  %v223_v29 = vld [vmem:[%s206_s10 + $0x78] sm:$0xff] }
  0x21   : > { %241 = vst.msk [vmem:[#allocation2 + $0x28] sm:$0xff] %vm224_vm1, %v232_v22  ;;  %v235_v30 = vpack.c.bf16 %v223_v29, %v222_v28  ;;  %242 = vst.msk [vmem:[#allocation2 + $0x30] sm:$0xff] %vm224_vm1, %v233_v26 }
  0x22   : > { %243 = vst.msk [vmem:[#allocation2 + $0x38] sm:$0xff] %vm224_vm1, %v234_v27 }
  0x23   : > { %244 = vst.msk [vmem:[#allocation2 + $0x40] sm:$0xff] %vm224_vm1, %v235_v30 }
  0x25   : > { %v254_v32 = vld [vmem:[#allocation2 + $0x8] sm:$0xff] }
  0x26   : > { %972 = vmatprep.mubr.msk.bf16.mxu1 %vm224_vm1, %v254_v32  ;;  %991 = vmatmul.mubr.msk.bf16.vlgmr.msra.gmra.mrb[0].mxu0 %vm224_vm1, %v254_v32  ;;  %v255_v33 = vld [vmem:[#allocation2 + $0x10] sm:$0xff]  ;;  %v256_v34 = vld [vmem:[#allocation2 + $0x18] sm:$0xff] }
  0x27   : > { %973 = vmatmul.mubr.msk.bf16.vlgmr.msra.gmra.mrb[0].mxu1 %vm224_vm1, %v255_v33  ;;  %1007 = vmatpush3.bf16.msra.mxu0 %v549_v31  ;;  %v257_v35 = vld [vmem:[#allocation2 + $0x20] sm:$0xff] }
  0x28   : > { %1025 = vmatpush3.bf16.msra.mxu1 %v414_v3  ;;  %994 = vmatprep.mubr.msk.bf16.mxu0 %vm224_vm1, %v255_v33  ;;  %v258_v36 = vld [vmem:[#allocation2 + $0x28] sm:$0xff]  ;;  %v259_v37 = vld [vmem:[#allocation2 + $0x30] sm:$0xff] }
  0x29   : > { %976 = vmatprep.mubr.msk.bf16.mxu1 %vm224_vm1, %v256_v34  ;;  %v260_v38 = vld [vmem:[#allocation2 + $0x38] sm:$0xff] }
  0x2a   : > { %v261_v39 = vld [vmem:[#allocation2 + $0x40] sm:$0xff] }
  0x2e   : > { %995 = vmatmul.mubr.msk.bf16.gmra.mrb[4].mxu0 %vm224_vm1, %v256_v34 }
  0x2f   : > { %977 = vmatmul.mubr.msk.bf16.gmra.mrb[4].mxu1 %vm224_vm1, %v257_v35  ;;  %1008 = vmatprep.mubr.msk.bf16.mxu0 %vm224_vm1, %v255_v33 }
  0x30   : > { %980 = vmatprep.mubr.msk.bf16.mxu1 %vm224_vm1, %v258_v36 }
  0x36   : > { %1009 = vmatmul.mubr.msk.bf16.vlgmr.msra.gmra.mrb[0].mxu0 %vm224_vm1, %v256_v34 }
  0x37   : > { %981 = vmatmul.mubr.msk.bf16.gmra.mrb[8].mxu1 %vm224_vm1, %v259_v37  ;;  %1012 = vmatprep.mubr.msk.bf16.mxu0 %vm224_vm1, %v257_v35 }
  0x38   : > { %984 = vmatprep.mubr.msk.bf16.mxu1 %vm224_vm1, %v260_v38 }
  0x3e   : > { %1013 = vmatmul.mubr.msk.bf16.gmra.mrb[4].mxu0 %vm224_vm1, %v258_v36 }
  0x3f   : > { %985 = vmatmul.mubr.msk.bf16.gmra.mrb[12].mxu1 %vm224_vm1, %v261_v39  ;;  %1016 = vmatprep.mubr.msk.bf16.mxu0 %vm224_vm1, %v259_v37 }
  0x40   : > { %998 = vmatprep.mubr.msk.bf16.mxu1 %vm224_vm1, %v257_v35 }
  0x46   : > { %1017 = vmatmul.mubr.msk.bf16.gmra.mrb[8].mxu0 %vm224_vm1, %v260_v38 }
  0x47   : > { %999 = vmatmul.mubr.msk.bf16.vlgmr.msra.gmra.mrb[8].mxu1 %vm224_vm1, %v258_v36  ;;  %1020 = vmatprep.mubr.msk.bf16.mxu0 %vm224_vm1, %v261_v39 }
  0x48   : > { %1002 = vmatprep.mubr.msk.bf16.mxu1 %vm224_vm1, %v259_v37 }
  0x4e   : > { %1021 = vmatmul.mubr.msk.bf16.gmra.mrb[12].mxu0 %vm224_vm1, %v521_v40 }
  0x4f   : > { %1003 = vmatmul.mubr.msk.bf16.gmra.mrb[12].mxu1 %vm224_vm1, %v260_v38 }
  0xfa   : > { %v974_v41 = vpop.f32.mrb[0].mxu1 }
  0xfb   : > { %v326_v42 = vpop.f32.mrb[1].mxu1 }
  0xfc   : > { %v975_v43 = vpop.f32.mrb[2].mxu1 }
  0xfd   : > { %v329_v44 = vpop.f32.mrb[3].mxu1 }
 0x102   : > { %v978_v45 = vpop.f32.mrb[4].mxu1 }
 0x103   : > { %v342_v46 = vpop.f32.mrb[5].mxu1 }
 0x104   : > { %v979_v47 = vpop.f32.mrb[6].mxu1 }
 0x105   : > { %v345_v48 = vpop.f32.mrb[7].mxu1 }
 0x109   : > { %v1010_v49 = vpop.f32.mrb[0].mxu0 }
 0x10a   : > { %v1026_v50 = vadd.f32 %v1010_v49, %v974_v41  ;;  %v585_v51 = vpop.f32.mrb[1].mxu0 }
 0x10b   : > { %v1027_v52 = vadd.f32 %v585_v51, %v326_v42  ;;  %v1011_v53 = vpop.f32.mrb[2].mxu0 }
 0x10c   : > { %760 = vst.msk [vmem:[%s1342_s13 + $0x10] sm:$0xff] %vm664_vm2, %v1026_v50  ;;  %v1028_v54 = vadd.f32 %v1011_v53, %v975_v43  ;;  %v588_v55 = vpop.f32.mrb[3].mxu0  ;;  %v706_v58 = vmul.f32 %v1026_v50, %v1026_v50  ;;  %v668_v0 = vsel %vm664_vm2, %v1026_v50, 0.0 }
 0x10d   : > { %v704_v56 = vmul.f32 %v1027_v52, %v1027_v52  ;;  %758 = vst.msk [vmem:[%s1342_s13] sm:$0xff] %vm664_vm2, %v1027_v52  ;;  %v1029_v57 = vadd.f32 %v588_v55, %v329_v44  ;;  %v665_v59 = vsel %vm664_vm2, %v1027_v52, 0.0 }
 0x10e   : > { %761 = vst.msk [vmem:[%s1342_s13 + $0x18] sm:$0xff] %vm664_vm2, %v1028_v54  ;;  %v707_v62 = vmul.f32 %v1028_v54, %v1028_v54  ;;  %v723_v8 = vsel %vm664_vm2, %v706_v58, 0.0  ;;  %v670_v9 = vsel %vm664_vm2, %v1028_v54, 0.0 }
 0x10f   : > { %v666_v60 = vsel %vm664_vm2, %v1029_v57, 0.0  ;;  %v705_v61 = vmul.f32 %v1029_v57, %v1029_v57  ;;  %759 = vst.msk [vmem:[%s1342_s13 + $0x8] sm:$0xff] %vm664_vm2, %v1029_v57  ;;  %v720_v1 = vsel %vm664_vm2, %v704_v56, 0.0 }
 0x110   : > { %v667_v63 = vadd.f32 %v666_v60, %v665_v59  ;;  %v725_v12 = vsel %vm664_vm2, %v707_v62, 0.0 }
 0x111   : > { %v721_v2 = vsel %vm664_vm2, %v705_v61, 0.0  ;;  %v1014_v3 = vpop.f32.mrb[4].mxu0 }
 0x112   : > { %v669_v4 = vadd.f32 %v668_v0, %v667_v63  ;;  %v722_v5 = vadd.f32 %v721_v2, %v720_v1  ;;  %v1030_v6 = vadd.f32 %v1014_v3, %v978_v45  ;;  %v601_v7 = vpop.f32.mrb[5].mxu0 }
 0x113   : > { %v1031_v10 = vadd.f32 %v601_v7, %v342_v46  ;;  %v1015_v11 = vpop.f32.mrb[6].mxu0 }
 0x114   : > { %v724_v13 = vadd.f32 %v723_v8, %v722_v5  ;;  %764 = vst.msk [vmem:[%s1342_s13 + $0x30] sm:$0xff] %vm664_vm2, %v1030_v6  ;;  %v671_v14 = vadd.f32 %v670_v9, %v669_v4  ;;  %v604_v15 = vpop.f32.mrb[7].mxu0  ;;  %v1032_v18 = vadd.f32 %v1015_v11, %v979_v47  ;;  %v710_v24 = vmul.f32 %v1030_v6, %v1030_v6 }
 0x115   : > { %v672_v16 = vsel %vm664_vm2, %v1031_v10, 0.0  ;;  %v708_v17 = vmul.f32 %v1031_v10, %v1031_v10  ;;  %762 = vst.msk [vmem:[%s1342_s13 + $0x20] sm:$0xff] %vm664_vm2, %v1031_v10  ;;  %v1033_v19 = vadd.f32 %v604_v15, %v345_v48  ;;  %v676_v28 = vsel %vm664_vm2, %v1030_v6, 0.0 }
 0x116   : > { %v673_v20 = vadd.f32 %v672_v16, %v671_v14  ;;  %v726_v21 = vadd.f32 %v725_v12, %v724_v13  ;;  %765 = vst.msk [vmem:[%s1342_s13 + $0x38] sm:$0xff] %vm664_vm2, %v1032_v18  ;;  %v711_v30 = vmul.f32 %v1032_v18, %v1032_v18  ;;  %v678_v35 = vsel %vm664_vm2, %v1032_v18, 0.0 }
 0x117   : > { %v727_v22 = vsel %vm664_vm2, %v708_v17, 0.0  ;;  %v674_v23 = vsel %vm664_vm2, %v1033_v19, 0.0  ;;  %763 = vst.msk [vmem:[%s1342_s13 + $0x28] sm:$0xff] %vm664_vm2, %v1033_v19  ;;  %v709_v27 = vmul.f32 %v1033_v19, %v1033_v19  ;;  %v731_v40 = vsel %vm664_vm2, %v710_v24, 0.0 }
 0x118   : > { %v728_v25 = vadd.f32 %v727_v22, %v726_v21  ;;  %v675_v26 = vadd.f32 %v674_v23, %v673_v20  ;;  %v733_v48 = vsel %vm664_vm2, %v711_v30, 0.0 }
 0x119   : > { %v1018_v29 = vpop.f32.mrb[8].mxu0  ;;  %v729_v32 = vsel %vm664_vm2, %v709_v27, 0.0 }
 0x11a   : > { %v677_v31 = vadd.f32 %v676_v28, %v675_v26  ;;  %v1000_v33 = vpop.f32.mrb[8].mxu1  ;;  %v617_v34 = vpop.f32.mrb[9].mxu0  ;;  %v730_v36 = vadd.f32 %v729_v32, %v728_v25 }
 0x11b   : > { %v1034_v37 = vadd.f32 %v1018_v29, %v1000_v33  ;;  %v482_v38 = vpop.f32.mrb[9].mxu1  ;;  %v1019_v39 = vpop.f32.mrb[10].mxu0 }
 0x11c   : > { %v1035_v41 = vadd.f32 %v617_v34, %v482_v38  ;;  %v679_v42 = vadd.f32 %v678_v35, %v677_v31  ;;  %v1001_v43 = vpop.f32.mrb[10].mxu1  ;;  %v620_v44 = vpop.f32.mrb[11].mxu0  ;;  %v732_v45 = vadd.f32 %v731_v40, %v730_v36 }
 0x11d   : > { %768 = vst.msk [vmem:[%s1342_s13 + $0x50] sm:$0xff] %vm664_vm2, %v1034_v37  ;;  %v1036_v46 = vadd.f32 %v1019_v39, %v1001_v43  ;;  %v485_v47 = vpop.f32.mrb[11].mxu1  ;;  %v714_v54 = vmul.f32 %v1034_v37, %v1034_v37  ;;  %v684_v62 = vsel %vm664_vm2, %v1034_v37, 0.0 }
 0x11e   : > { %v680_v49 = vsel %vm664_vm2, %v1035_v41, 0.0  ;;  %v712_v50 = vmul.f32 %v1035_v41, %v1035_v41  ;;  %766 = vst.msk [vmem:[%s1342_s13 + $0x40] sm:$0xff] %vm664_vm2, %v1035_v41  ;;  %v1037_v51 = vadd.f32 %v620_v44, %v485_v47  ;;  %v734_v53 = vadd.f32 %v733_v48, %v732_v45 }
 0x11f   : > { %v681_v52 = vadd.f32 %v680_v49, %v679_v42  ;;  %769 = vst.msk [vmem:[%s1342_s13 + $0x58] sm:$0xff] %vm664_vm2, %v1036_v46  ;;  %v715_v59 = vmul.f32 %v1036_v46, %v1036_v46  ;;  %v739_v7 = vsel %vm664_vm2, %v714_v54, 0.0  ;;  %v686_v8 = vsel %vm664_vm2, %v1036_v46, 0.0 }
 0x120   : > { %v735_v55 = vsel %vm664_vm2, %v712_v50, 0.0  ;;  %v682_v56 = vsel %vm664_vm2, %v1037_v51, 0.0  ;;  %v713_v57 = vmul.f32 %v1037_v51, %v1037_v51  ;;  %767 = vst.msk [vmem:[%s1342_s13 + $0x48] sm:$0xff] %vm664_vm2, %v1037_v51 }
 0x121   : > { %v736_v58 = vadd.f32 %v735_v55, %v734_v53  ;;  %v683_v60 = vadd.f32 %v682_v56, %v681_v52  ;;  %v1022_v61 = vpop.f32.mrb[12].mxu0  ;;  %v741_v12 = vsel %vm664_vm2, %v715_v59, 0.0 }
 0x122   : > { %v737_v63 = vsel %vm664_vm2, %v713_v57, 0.0  ;;  %v1004_v0 = vpop.f32.mrb[12].mxu1  ;;  %v633_v1 = vpop.f32.mrb[13].mxu0 }
 0x123   : > { %v685_v2 = vadd.f32 %v684_v62, %v683_v60  ;;  %v738_v3 = vadd.f32 %v737_v63, %v736_v58  ;;  %v1038_v4 = vadd.f32 %v1022_v61, %v1004_v0  ;;  %v498_v5 = vpop.f32.mrb[13].mxu1  ;;  %v1023_v6 = vpop.f32.mrb[14].mxu0 }
 0x124   : > { %v1039_v9 = vadd.f32 %v633_v1, %v498_v5  ;;  %v1005_v10 = vpop.f32.mrb[14].mxu1  ;;  %v636_v11 = vpop.f32.mrb[15].mxu0 }
 0x125   : > { %v740_v13 = vadd.f32 %v739_v7, %v738_v3  ;;  %772 = vst.msk [vmem:[%s1342_s13 + $0x70] sm:$0xff] %vm664_vm2, %v1038_v4  ;;  %v687_v14 = vadd.f32 %v686_v8, %v685_v2  ;;  %v501_v15 = vpop.f32.mrb[15].mxu1  ;;  %v1040_v18 = vadd.f32 %v1023_v6, %v1005_v10  ;;  %v718_v24 = vmul.f32 %v1038_v4, %v1038_v4 }
 0x126   : > { %v688_v16 = vsel %vm664_vm2, %v1039_v9, 0.0  ;;  %v716_v17 = vmul.f32 %v1039_v9, %v1039_v9  ;;  %770 = vst.msk [vmem:[%s1342_s13 + $0x60] sm:$0xff] %vm664_vm2, %v1039_v9  ;;  %v1041_v19 = vadd.f32 %v636_v11, %v501_v15 }
 0x127   : > { %v689_v20 = vadd.f32 %v688_v16, %v687_v14  ;;  %v742_v21 = vadd.f32 %v741_v12, %v740_v13  ;;  %773 = vst.msk [vmem:[%s1342_s13 + $0x78] sm:$0xff] %vm664_vm2, %v1040_v18 }
 0x128   : > { %v743_v22 = vsel %vm664_vm2, %v716_v17, 0.0  ;;  %v690_v23 = vsel %vm664_vm2, %v1041_v19, 0.0  ;;  %771 = vst.msk [vmem:[%s1342_s13 + $0x68] sm:$0xff] %vm664_vm2, %v1041_v19  ;;  %v717_v27 = vmul.f32 %v1041_v19, %v1041_v19 }
 0x129   : > { %v744_v25 = vadd.f32 %v743_v22, %v742_v21  ;;  %v691_v26 = vadd.f32 %v690_v23, %v689_v20 }
 0x12a   : > { %1122 = shalt.err (!%p1119_p3)
}
 0x12b   : > { %s1123_s6 = scalar_lea.hbm %s1399_s26, 2048  ;;  %s1127_s9 = scalar_lea.hbm %s1492_s3, 4096 }
 0x12c   : > { %p1124_p4 = scmp.ne.s32.totalorder %s1399_s26, %s1123_s6  ;;  %p1128_p9 = scmp.lt.u32.totalorder %s1399_s26, %s1492_s3 }
 0x12d   : > { %p1129_p10 = scmp.lt.u32.totalorder %s1127_s9, %s1123_s6  ;;  %p1131_p12 = scmp.lt.u32.totalorder %s1123_s6, %s1399_s26 }
 0x12e   : > { %p1125_p7 = pnand %p1124_p4, %p1273_p5 }
 0x12f   : > { %p1130_p11 = por %p1129_p10, %p1128_p9 }
 0x130   : > { %p1126_p8 = pneg %p1125_p7 }
 0x131   : > { %p1132_p13 = por %p1131_p12, %p1130_p11 }
 0x133   : > { %p1133_p0 = pnand %p1132_p13, %p1126_p8 }
 0x135   : > { %1136 = shalt.err (!%p1133_p0)
}
 0x136   : > { %s1207_s13 = smov 128   ;;  %s1208_s14 = smov 8   ;;  %v692_v28 = vsel %vm664_vm2, %v1038_v4, 0.0  ;;  %v719_v29 = vmul.f32 %v1040_v18, %v1040_v18  ;;  %v745_v31 = vsel %vm664_vm2, %v717_v27, 0.0  ;;  %v694_v32 = vsel %vm664_vm2, %v1040_v18, 0.0 }
 0x137   : > { %1062 = dma.vmem_to_hbm [thread:$0]  (%p1273_p5), %s1401_s19, 2048, %s1399_s26, %s775_s27, %s1207_s13, %s1207_s13, %s1208_s14   ;;  %v693_v30 = vadd.f32 %v692_v28, %v691_v26  ;;  %v746_v33 = vadd.f32 %v745_v31, %v744_v25  ;;  %v747_v34 = vsel %vm664_vm2, %v718_v24, 0.0  ;;  %vm702_vm3 = vcmask 253952  }
 0x138   : > { %v749_v37 = vsel %vm664_vm2, %v719_v29, 0.0  ;;  %s905_s19 = sshll.u32 %s1339_s11, 1  ;;  %s938_s21 = sshll.u32 %s1256_s18, 5 }
 0x139   : > { %v695_v35 = vadd.f32 %v694_v32, %v693_v30  ;;  %v748_v36 = vadd.f32 %v747_v34, %v746_v33  ;;  %s201_s22 = scalar_lea.vmem [#allocation5], %s905_s19  ;;  %s1446_s29 = scalar_lea.hbm %s1493_s4, %s938_s21 }
 0x13a   : > { %s809_s26 = sshll.u32 %s201_s22, 4  ;;  %s780_s30 = scalar_lea.sflag [#allocation6], %s1339_s11  ;;  %s1448_s26 = int_to_ptr.vmem [resolvable:$true] %s809_s26 }
 0x13b   : > { %v696_v38 = vrot.slane %v695_v35, 4  ;;  %v750_v39 = vadd.f32 %v749_v37, %v748_v36  ;;  %s1137_s5 = scalar_lea.vmem %s1448_s26, 32  ;;  %s1209_s18 = smov [#allocation5]  }
 0x13c   : > { %p1138_p1 = scmp.ne.s32.totalorder %s1448_s26, %s1137_s5  ;;  %s1141_s6 = sshll.u32 %s1209_s18, 4  ;;  %s1142_s6 = int_to_ptr.vmem [resolvable:$false] %s1141_s6 }
 0x13d   : > { %v697_v40 = vadd.f32 %v696_v38, %v695_v35  ;;  %v751_v41 = vrot.slane %v750_v39, 4  ;;  %s1143_s7 = scalar_lea.vmem %s1142_s6, 64  ;;  %p1144_p4 = scmp.lt.s32.totalorder %s1448_s26, %s1142_s6 }
 0x13e   : > { %p1139_p2 = pnand %p1138_p1, %p1273_p5  ;;  %p1145_p7 = scmp.lt.s32.totalorder %s1143_s7, %s1137_s5 }
 0x13f   : > { %v698_v42 = vrot.slane %v697_v40, 2  ;;  %v752_v43 = vadd.f32 %v751_v41, %v750_v39 }
 0x140   : > { %p1140_p3 = pneg %p1139_p2  ;;  %p1146_p8 = por %p1145_p7, %p1144_p4 }
 0x141   : > { %v699_v44 = vadd.f32 %v698_v42, %v697_v40  ;;  %v753_v45 = vrot.slane %v752_v43, 2 }
 0x142   : > { %p1147_p9 = pnand %p1146_p8, %p1140_p3 }
 0x143   : > { %v700_v46 = vrot.slane %v699_v44, 1  ;;  %v754_v47 = vadd.f32 %v753_v45, %v752_v43 }
 0x145   : > { %v701_v48 = vadd.f32 %v700_v46, %v699_v44  ;;  %v755_v49 = vrot.slane %v754_v47, 1 }
 0x147   : > { %703 = vst.msk [vmem:[%s201_s22] sm:$0x1] %vm702_vm3, %v701_v48  ;;  %v756_v50 = vadd.f32 %v755_v49, %v754_v47 }
 0x149   : > { %757 = vst.msk [vmem:[%s201_s22 + $0x1] sm:$0x1] %vm702_vm3, %v756_v50 }
 0x14a   : > { %1150 = shalt.err (!%p1147_p9)
}
 0x14b   : > { %s1151_s11 = scalar_lea.hbm %s1446_s29, 32  ;;  %s1155_s10 = scalar_lea.hbm %s1493_s4, 64 }
 0x14c   : > { %p1152_p10 = scmp.ne.s32.totalorder %s1446_s29, %s1151_s11  ;;  %p1156_p13 = scmp.lt.u32.totalorder %s1446_s29, %s1493_s4 }
 0x14d   : > { %p1157_p0 = scmp.lt.u32.totalorder %s1155_s10, %s1151_s11  ;;  %p1159_p2 = scmp.lt.u32.totalorder %s1151_s11, %s1446_s29 }
 0x14e   : > { %p1153_p11 = pnand %p1152_p10, %p1273_p5 }
 0x14f   : > { %p1158_p1 = por %p1157_p0, %p1156_p13 }
 0x150   : > { %p1154_p12 = pneg %p1153_p11 }
 0x151   : > { %p1160_p3 = por %p1159_p2, %p1158_p1 }
 0x153   : > { %p1161_p4 = pnand %p1160_p3, %p1154_p12 }
 0x155   : > { %1164 = shalt.err (!%p1161_p4)
}
 0x156   : > { %1063 = dma.vmem_to_hbm [thread:$0]  (%p1273_p5), %s1448_s26, 32, %s1446_s29, %s780_s30  }
 0x157 PF: > { %p1073_p7 = scmp.ge.s32.totalorder %s1203_s17, 2  ;;  %s821_s14 = sand.u32 1, %s1191_s15  }
 0x158   : > { %s822_s19 = scalar_lea.sflag [#allocation4], %s821_s14 }
 0x159   : > { %p1067_p8 = pnand %p1073_p7, %p1277_p6 }
 0x15b   : > { %1182 = dma.done.wait (!%p1067_p8), %s822_s19, 2048  }
 0x15c   : > { %1184 = vsyncadd (!%p1067_p8), %s822_s19, 4294965248  ;;  %s831_s21 = scalar_lea.sflag [#allocation6], %s821_s14 }
 0x15d   : > { %1186 = dma.done.wait (!%p1067_p8), %s831_s21, 32  }
 0x15e   : > { %1188 = vsyncadd (!%p1067_p8), %s831_s21, 4294967264  ;;  %p18_p5 = scmp.ge.s32.totalorder %s1260_s20, 4   ;;  %s1496_s15 = smov %s1195_s16 }
 0x15f   : > { %s1497_s16 = smov %s1199_s0  ;;  %s1498_s0 = smov %s1271_s23 }
 0x160   : > { %s1499_s17 = smov %s1260_s20  ;;  %20 = sbr.rel (!%p18_p5) target bundleno = 5 (0x5), region = 89 }
 0x167   :  { %836 = vsyncpa [#allocation4], 1 }
 0x168   :  { %838 = vsyncpa [#allocation4 + $0x1], 1 }
 0x169   :  { %839 = vsyncpa [#allocation6], 1 }
 0x16a   :  { %841 = vsyncpa [#allocation6 + $0x1], 1 }

</bundles_post_ra>
